<compile_context>
chip_gen: v6e
topology: v6e:2x2x1
jax: 0.10.0
libtpu: 0.0.40
codegen_flags: <defaults>
</compile_context>

<pallas_src>
import functools

import jax
import jax.numpy as jnp
from jax.experimental import pallas as pl
from jax.experimental.pallas import tpu as pltpu


D_PAD = 128  # lane-dense output / table width


# ---------------------------------------------------------------------------
# Kernel: SMEM-index-driven gather from a VMEM-resident fused table
# ---------------------------------------------------------------------------

def _make_gather_kernel(tm):
    """Kernel over one (tm, D_PAD) output block.

    idx_ref:   (M_pad,) int32 in SMEM (scalar-prefetched global row ids)
    table_ref: (C_pad, D_PAD) f32 in VMEM (fused, padded embedding table)
    out_ref:   (tm, D_PAD) f32 in VMEM
    """

    def kernel(idx_ref, table_ref, out_ref):
        base = pl.program_id(0) * tm

        def copy_row(r):
            row_id = idx_ref[base + r]                         # scalar from SMEM
            out_ref[pl.ds(r, 1), :] = table_ref[pl.ds(row_id, 1), :]

        if tm <= 16:
            # short fixed trip count: static unroll
            for r in range(tm):
                copy_row(r)
        else:
            def body(r, carry):
                copy_row(r)
                return carry
            jax.lax.fori_loop(0, tm, body, 0, unroll=8)

    return kernel


# ---------------------------------------------------------------------------
# One-time prep (hoisted out of the per-step path): fuse + pad the tables
# ---------------------------------------------------------------------------

def build_fused_table(tables, d_pad=D_PAD):
    """Concatenate per-field tables into one (C_pad, d_pad) f32 slab.

    Returns (big_table, offsets, sizes).  Call ONCE; the fused table is a
    parameter of the model, not per-call work.
    """
    sizes = [int(t.shape[0]) for t in tables]
    offsets, acc = [], 0
    for n in sizes:
        offsets.append(acc)
        acc += n
    c_pad = ((acc + 7) // 8) * 8                               # sublane-align rows

    big = jnp.zeros((c_pad, d_pad), jnp.float32)
    row = 0
    for t in tables:
        n, d = t.shape
        big = big.at[row:row + n, :d].set(t.astype(jnp.float32))
        row += n
    return (big,
            jnp.asarray(offsets, dtype=jnp.int32),
            jnp.asarray(sizes, dtype=jnp.int32))


# ---------------------------------------------------------------------------
# Per-step forward (jitted): index prep + ONE pallas_call
# ---------------------------------------------------------------------------

@functools.partial(jax.jit, static_argnames=("embedding_dim",))
def multi_embeddings_fwd(big_table, offsets, sizes, x, *, embedding_dim):
    """big_table: (C_pad, D_PAD) f32; x: (B, F) int -> (B, F, embedding_dim) f32."""
    B, F = x.shape
    C_pad, D_pad = big_table.shape

    # Clamp into each field's valid range (torch would error on OOB), then
    # fold the static per-field row offsets into the indices.
    xi = jnp.clip(x.astype(jnp.int32), 0, sizes[None, :] - 1) + offsets[None, :]

    M = B * F
    TM = 8 if M <= 256 else 256                                # rows per block
    M_pad = pl.cdiv(M, TM) * TM
    idx = jnp.zeros((M_pad,), jnp.int32).at[:M].set(xi.reshape(M))

    itemsize = jnp.dtype(big_table.dtype).itemsize
    table_bytes = C_pad * D_pad * itemsize
    out_blk_bytes = TM * D_pad * itemsize
    vmem_limit = int(min(128 * 1024 * 1024,
                         2 * table_bytes + 4 * out_blk_bytes + (2 << 20)))

    out = pl.pallas_call(
        _make_gather_kernel(TM),
        out_shape=jax.ShapeDtypeStruct((M_pad, D_pad), big_table.dtype),
        grid_spec=pltpu.PrefetchScalarGridSpec(
            num_scalar_prefetch=1,                             # idx -> SMEM
            grid=(M_pad // TM,),
            in_specs=[
                # fused table: whole array, VMEM-resident across the grid
                pl.BlockSpec((C_pad, D_pad), lambda i, idx_ref: (0, 0)),
            ],
            out_specs=pl.BlockSpec((TM, D_pad), lambda i, idx_ref: (i, 0)),
        ),
        compiler_params=pltpu.CompilerParams(
            dimension_semantics=("parallel",),                 # 2 TCs on v7x
            vmem_limit_bytes=vmem_limit,
        ),
    )(idx, big_table)

    return out[:M, :embedding_dim].reshape(B, F, embedding_dim)


# ---------------------------------------------------------------------------

if __name__ == "__main__":
    key = jax.random.PRNGKey(0)
    kp, kx = jax.random.split(key)

    num_categories_per_field = (6, 3, 2, 2, 2, 2, 10)
    D = 10
    B = 2
    F = len(num_categories_per_field)

    tkeys = jax.random.split(kp, F)
    tables = tuple(0.1 * jax.random.normal(tk, (n, D), dtype=jnp.float32)
                   for tk, n in zip(tkeys, num_categories_per_field))

    maxes = jnp.asarray(num_categories_per_field, dtype=jnp.int32)
    x = jax.random.randint(kx, (B, F), 0, 10_000, dtype=jnp.int32) % maxes

    # One-time prep (hoisted out of the per-step forward).
    big_table, offsets, sizes = build_fused_table(tables)

    out = multi_embeddings_fwd(big_table, offsets, sizes, x, embedding_dim=D)
    out = jax.block_until_ready(out)

    # Pure-JAX reference of the PyTorch semantics: per-field gather + stack.
    ref = jnp.stack([tables[i][x[:, i]] for i in range(F)], axis=1)

    assert out.shape == (B, F, D) and out.dtype == jnp.float32
    assert jnp.allclose(out, ref, atol=1e-6), "mismatch vs reference gather"
    print("KERNEL_OK")
</pallas_src>

<mosaic_0001>
module attributes {stable_mosaic.version = 11 : i64} {
  func.func @kernel(%arg0: i32, %arg1: memref<16xi32, #tpu.memory_space<smem>>, %arg2: memref<32x128xf32, #tpu.memory_space<vmem>>, %arg3: memref<8x128xf32, #tpu.memory_space<vmem>>) attributes {dimension_semantics = [#tpu.dimension_semantics<parallel>], iteration_bounds = array<i64: 2>, scalar_prefetch = 1 : i64, scratch_operands = 0 : i64, tpu.core_type = #tpu.core_type<tc>, window_params = [{pipeline_mode = #tpu.pipeline_mode<synchronous>, transform_indices = @transform_0, window_bounds = array<i64: 32, 128>}, {transform_indices = @transform_1, window_bounds = array<i64: 8, 128>}]} {
    %c8_i32 = arith.constant 8 : i32
    %0 = arith.muli %arg0, %c8_i32 : i32
    %c0_i32 = arith.constant 0 : i32
    %1 = arith.addi %0, %c0_i32 : i32
    %2 = arith.index_cast %1 : i32 to index
    %3 = memref.load %arg1[%2] : memref<16xi32, #tpu.memory_space<smem>>
    %4 = arith.index_cast %3 : i32 to index
    %c0 = arith.constant 0 : index
    %5 = vector.load %arg2[%4, %c0] : memref<32x128xf32, #tpu.memory_space<vmem>>, vector<1x128xf32>
    %c0_0 = arith.constant 0 : index
    %c0_1 = arith.constant 0 : index
    %6 = vector.load %arg3[%c0_0, %c0_1] : memref<8x128xf32, #tpu.memory_space<vmem>>, vector<1x128xf32>
    tpu.vector_store %arg3[%c0_0, %c0_1], %5 {strides = array<i32>} : memref<8x128xf32, #tpu.memory_space<vmem>>, vector<1x128xf32>,
    %c1_i32 = arith.constant 1 : i32
    %7 = arith.addi %0, %c1_i32 : i32
    %8 = arith.index_cast %7 : i32 to index
    %9 = memref.load %arg1[%8] : memref<16xi32, #tpu.memory_space<smem>>
    %10 = arith.index_cast %9 : i32 to index
    %c0_2 = arith.constant 0 : index
    %11 = vector.load %arg2[%10, %c0_2] : memref<32x128xf32, #tpu.memory_space<vmem>>, vector<1x128xf32>
    %c1 = arith.constant 1 : index
    %c0_3 = arith.constant 0 : index
    %12 = vector.load %arg3[%c1, %c0_3] : memref<8x128xf32, #tpu.memory_space<vmem>>, vector<1x128xf32>
    tpu.vector_store %arg3[%c1, %c0_3], %11 {strides = array<i32>} : memref<8x128xf32, #tpu.memory_space<vmem>>, vector<1x128xf32>,
    %c2_i32 = arith.constant 2 : i32
    %13 = arith.addi %0, %c2_i32 : i32
    %14 = arith.index_cast %13 : i32 to index
    %15 = memref.load %arg1[%14] : memref<16xi32, #tpu.memory_space<smem>>
    %16 = arith.index_cast %15 : i32 to index
    %c0_4 = arith.constant 0 : index
    %17 = vector.load %arg2[%16, %c0_4] : memref<32x128xf32, #tpu.memory_space<vmem>>, vector<1x128xf32>
    %c2 = arith.constant 2 : index
    %c0_5 = arith.constant 0 : index
    %18 = vector.load %arg3[%c2, %c0_5] : memref<8x128xf32, #tpu.memory_space<vmem>>, vector<1x128xf32>
    tpu.vector_store %arg3[%c2, %c0_5], %17 {strides = array<i32>} : memref<8x128xf32, #tpu.memory_space<vmem>>, vector<1x128xf32>,
    %c3_i32 = arith.constant 3 : i32
    %19 = arith.addi %0, %c3_i32 : i32
    %20 = arith.index_cast %19 : i32 to index
    %21 = memref.load %arg1[%20] : memref<16xi32, #tpu.memory_space<smem>>
    %22 = arith.index_cast %21 : i32 to index
    %c0_6 = arith.constant 0 : index
    %23 = vector.load %arg2[%22, %c0_6] : memref<32x128xf32, #tpu.memory_space<vmem>>, vector<1x128xf32>
    %c3 = arith.constant 3 : index
    %c0_7 = arith.constant 0 : index
    %24 = vector.load %arg3[%c3, %c0_7] : memref<8x128xf32, #tpu.memory_space<vmem>>, vector<1x128xf32>
    tpu.vector_store %arg3[%c3, %c0_7], %23 {strides = array<i32>} : memref<8x128xf32, #tpu.memory_space<vmem>>, vector<1x128xf32>,
    %c4_i32 = arith.constant 4 : i32
    %25 = arith.addi %0, %c4_i32 : i32
    %26 = arith.index_cast %25 : i32 to index
    %27 = memref.load %arg1[%26] : memref<16xi32, #tpu.memory_space<smem>>
    %28 = arith.index_cast %27 : i32 to index
    %c0_8 = arith.constant 0 : index
    %29 = vector.load %arg2[%28, %c0_8] : memref<32x128xf32, #tpu.memory_space<vmem>>, vector<1x128xf32>
    %c4 = arith.constant 4 : index
    %c0_9 = arith.constant 0 : index
    %30 = vector.load %arg3[%c4, %c0_9] : memref<8x128xf32, #tpu.memory_space<vmem>>, vector<1x128xf32>
    tpu.vector_store %arg3[%c4, %c0_9], %29 {strides = array<i32>} : memref<8x128xf32, #tpu.memory_space<vmem>>, vector<1x128xf32>,
    %c5_i32 = arith.constant 5 : i32
    %31 = arith.addi %0, %c5_i32 : i32
    %32 = arith.index_cast %31 : i32 to index
    %33 = memref.load %arg1[%32] : memref<16xi32, #tpu.memory_space<smem>>
    %34 = arith.index_cast %33 : i32 to index
    %c0_10 = arith.constant 0 : index
    %35 = vector.load %arg2[%34, %c0_10] : memref<32x128xf32, #tpu.memory_space<vmem>>, vector<1x128xf32>
    %c5 = arith.constant 5 : index
    %c0_11 = arith.constant 0 : index
    %36 = vector.load %arg3[%c5, %c0_11] : memref<8x128xf32, #tpu.memory_space<vmem>>, vector<1x128xf32>
    tpu.vector_store %arg3[%c5, %c0_11], %35 {strides = array<i32>} : memref<8x128xf32, #tpu.memory_space<vmem>>, vector<1x128xf32>,
    %c6_i32 = arith.constant 6 : i32
    %37 = arith.addi %0, %c6_i32 : i32
    %38 = arith.index_cast %37 : i32 to index
    %39 = memref.load %arg1[%38] : memref<16xi32, #tpu.memory_space<smem>>
    %40 = arith.index_cast %39 : i32 to index
    %c0_12 = arith.constant 0 : index
    %41 = vector.load %arg2[%40, %c0_12] : memref<32x128xf32, #tpu.memory_space<vmem>>, vector<1x128xf32>
    %c6 = arith.constant 6 : index
    %c0_13 = arith.constant 0 : index
    %42 = vector.load %arg3[%c6, %c0_13] : memref<8x128xf32, #tpu.memory_space<vmem>>, vector<1x128xf32>
    tpu.vector_store %arg3[%c6, %c0_13], %41 {strides = array<i32>} : memref<8x128xf32, #tpu.memory_space<vmem>>, vector<1x128xf32>,
    %c7_i32 = arith.constant 7 : i32
    %43 = arith.addi %0, %c7_i32 : i32
    %44 = arith.index_cast %43 : i32 to index
    %45 = memref.load %arg1[%44] : memref<16xi32, #tpu.memory_space<smem>>
    %46 = arith.index_cast %45 : i32 to index
    %c0_14 = arith.constant 0 : index
    %47 = vector.load %arg2[%46, %c0_14] : memref<32x128xf32, #tpu.memory_space<vmem>>, vector<1x128xf32>
    %c7 = arith.constant 7 : index
    %c0_15 = arith.constant 0 : index
    %48 = vector.load %arg3[%c7, %c0_15] : memref<8x128xf32, #tpu.memory_space<vmem>>, vector<1x128xf32>
    tpu.vector_store %arg3[%c7, %c0_15], %47 {strides = array<i32>} : memref<8x128xf32, #tpu.memory_space<vmem>>, vector<1x128xf32>,
    return
  }
  func.func @transform_0(%arg0: i32, %arg1: memref<16xi32, #tpu.memory_space<smem>>) -> (i32, i32) {
    %c0_i32 = arith.constant 0 : i32
    %c0_i32_0 = arith.constant 0 : i32
    %c0_i32_1 = arith.constant 0 : i32
    return %c0_i32, %c0_i32_0 : i32, i32
  }
  func.func @transform_1(%arg0: i32, %arg1: memref<16xi32, #tpu.memory_space<smem>>) -> (i32, i32) {
    %c0_i32 = arith.constant 0 : i32
    %c0_i32_0 = arith.constant 0 : i32
    return %arg0, %c0_i32 : i32, i32
  }
}

</mosaic_0001>

<bundles_post_ra>
// kernel: multi_embeddings_fwd.1
= control target key start
LH: loop header
LB: loop body
LE: loop exit
PB: predicated region body
PF: predicated region fallthrough
CT: control target
= control target key end

     0   :  { %s371_s0 = inlined_call_operand.vmem [shape: s32[16], index: 0, kind: input, shape index: {}]   ;;  %s372_s1 = inlined_call_operand.hbm [shape: f32[32,128], index: 1, kind: input, shape index: {}]   ;;  %s373_s2 = inlined_call_operand.vmem [shape: f32[16,128], index: 2, kind: output, shape index: {}]  }
   0x1   :  { %s7_s11 = sshll.u32 %s371_s0, 4  ;;  %s8_s11 = int_to_ptr.vmem [resolvable:$true] %s7_s11 }
   0x2   :  { %s250_s12 = scalar_lea.vmem %s8_s11, 16  ;;  %p255_p1 = scmp.lt.s32.totalorder %s8_s11, %s8_s11 }
   0x3   :  { %p251_p0 = scmp.ne.s32.totalorder %s8_s11, %s250_s12  ;;  %p256_p2 = scmp.lt.s32.totalorder %s250_s12, %s250_s12 }
   0x5   :  { %p257_p3 = por %p256_p2, %p255_p1 }
   0x7   :  { %p258_p4 = pnand %p257_p3, %p251_p0 }
   0x9   :  { %261 = shalt.err (!%p258_p4)  }
   0xa   :  { %s302_s13 = smov [#allocation3]  }
   0xb   :  { %10 = dma.vmem_to_smem %s8_s11, 16, %s302_s13, [#allocation2] }
   0xc   :  { %292 = dma.done.wait [#allocation2], 16 }
   0xd   :  { %293 = vsyncadd [#allocation2], 4294967280 }
   0xe   :  { %12 = sfence }
   0xf   :  { %13 = vsyncpa [#allocation5], 0  ;;  %s324_s14 = smov 0  }
  0x10 LB: > { %s330_s0 = sadd.s32 4294967295, %s300_s14   ;;  %p220_p5 = scmp.ge.s32.totalorder %s300_s14, 1  ;;  %s300_s14 = sphi %s324_s14, %s19_s14  }
  0x11   : > { %p71_p6 = scmp.lt.s32.totalorder %s300_s14, 3  ;;  %s303_s15 = smov [#allocation4]  }
  0x12   : > { %s83_s16 = sshll.u32 %s303_s15, 4  ;;  %p236_p8 = scmp.eq.s32.totalorder %s330_s0, 0  ;;  %s84_s16 = int_to_ptr.vmem [resolvable:$true] %s83_s16 }
  0x13   : > { %p334_p7 = pnand %p220_p5, %p71_p6  ;;  %s273_s18 = scalar_lea.vmem %s84_s16, 512 }
  0x14   : > { %p274_p12 = scmp.ne.s32.totalorder %s84_s16, %s273_s18  ;;  %p281_p1 = scmp.lt.s32.totalorder %s84_s16, %s84_s16 }
  0x15   : > { %p232_p9 = pneg %p334_p7  ;;  %p282_p2 = scmp.lt.s32.totalorder %s273_s18, %s273_s18 }
  0x17   : > { %p233_p10 = pnand %p236_p8, %p232_p9  ;;  %p283_p3 = por %p282_p2, %p281_p1 }
  0x19   : > { %p264_p11 = pneg %p233_p10 }
  0x1b   : > { %p276_p13 = pnand %p274_p12, %p264_p11 }
  0x1d   : > { %p277_p0 = pneg %p276_p13 }
  0x1f   : > { %p284_p4 = pnand %p283_p3, %p277_p0 }
  0x21   : > { %287 = shalt.err (!%p284_p4)
}
  0x22   : > { %s304_s19 = smov 128   ;;  %s305_s20 = smov 8  }
  0x23   : > { %235 = dma.hbm_to_vmem [thread:$0]  (!%p233_p10), %s372_s1, 512, %s84_s16, [#allocation5], %s304_s19, %s304_s19, %s305_s20  }
  0x24   : > { %99 = sbr.rel (%p334_p7) target bundleno = 62 (0x3e), region = 24 }
  0x29   : > { %295 = dma.done.wait (%p236_p8), [#allocation5], 512  }
  0x2a   : > { %297 = vsyncadd (%p236_p8), [#allocation5], 4294966784  ;;  %p113_p5 = scmp.lt.s32.totalorder %s330_s0, 1  ;;  %s225_s23 = sshll.u32 %s330_s0, 3 }
  0x2b   : > { %s118_s24 = sld [smem:[#allocation3 + %s225_s23]]  ;;  %s122_s25 = sadd.s32 1, %s225_s23 }
  0x2c   : > { %s376_s0 = smov (!%p113_p5, %s330_s0), 1  ;;  %s123_s26 = sld [smem:[#allocation3 + %s122_s25]] }
  0x2d   : > { %s127_s27 = sadd.s32 2, %s225_s23  ;;  %s224_s28 = sshll.u32 %s376_s0, 3 }
  0x2e   : > { %s128_s29 = sld [smem:[#allocation3 + %s127_s27]]  ;;  %s358_s4 = scalar_lea.vmem %s373_s2, %s224_s28 }
  0x2f   : > { %s132_s5 = sadd.s32 3, %s225_s23  ;;  %s137_s7 = sadd.s32 4, %s225_s23 }
  0x30   : > { %s133_s6 = sld [smem:[#allocation3 + %s132_s5]]  ;;  %s142_s10 = sadd.s32 5, %s225_s23 }
  0x31   : > { %s138_s8 = sld [smem:[#allocation3 + %s137_s7]]  ;;  %s119_s9 = scalar_lea.vmem [#allocation4], %s118_s24 }
  0x32   : > { %v120_v0 = vld [vmem:[%s119_s9] sm:$0x1]  ;;  %s147_s11 = sadd.s32 6, %s225_s23  ;;  %s143_s12 = sld [smem:[#allocation3 + %s142_s10]] }
  0x33   : > { %121 = vst [vmem:[%s358_s4] sm:$0x1] %v120_v0  ;;  %s124_s13 = scalar_lea.vmem [#allocation4], %s123_s26  ;;  %s148_s0 = sld [smem:[#allocation3 + %s147_s11]] }
  0x34   : > { %v125_v1 = vld [vmem:[%s124_s13] sm:$0x1]  ;;  %s129_s15 = scalar_lea.vmem [#allocation4], %s128_s29  ;;  %s152_s16 = sadd.s32 7, %s225_s23 }
  0x35   : > { %126 = vst [vmem:[%s358_s4 + $0x1] sm:$0x1] %v125_v1  ;;  %v130_v2 = vld [vmem:[%s129_s15] sm:$0x1]  ;;  %s153_s17 = sld [smem:[#allocation3 + %s152_s16]] }
  0x36   : > { %131 = vst [vmem:[%s358_s4 + $0x2] sm:$0x1] %v130_v2  ;;  %s134_s18 = scalar_lea.vmem [#allocation4], %s133_s6 }
  0x37   : > { %v135_v3 = vld [vmem:[%s134_s18] sm:$0x1]  ;;  %s139_s19 = scalar_lea.vmem [#allocation4], %s138_s8 }
  0x38   : > { %136 = vst [vmem:[%s358_s4 + $0x3] sm:$0x1] %v135_v3  ;;  %v140_v4 = vld [vmem:[%s139_s19] sm:$0x1]  ;;  %s144_s20 = scalar_lea.vmem [#allocation4], %s143_s12 }
  0x39   : > { %141 = vst [vmem:[%s358_s4 + $0x4] sm:$0x1] %v140_v4  ;;  %v145_v5 = vld [vmem:[%s144_s20] sm:$0x1]  ;;  %s149_s21 = scalar_lea.vmem [#allocation4], %s148_s0 }
  0x3a   : > { %146 = vst [vmem:[%s358_s4 + $0x5] sm:$0x1] %v145_v5  ;;  %v150_v6 = vld [vmem:[%s149_s21] sm:$0x1] }
  0x3b   : > { %151 = vst [vmem:[%s358_s4 + $0x6] sm:$0x1] %v150_v6  ;;  %s154_s22 = scalar_lea.vmem [#allocation4], %s153_s17 }
  0x3c   : > { %v155_v7 = vld [vmem:[%s154_s22] sm:$0x1] }
  0x3d   : > { %156 = vst [vmem:[%s358_s4 + $0x7] sm:$0x1] %v155_v7 }
  0x3e PF: > { %s19_s14 = sadd.s32 1, %s300_s14  }
  0x3f   : > { %p16_p6 = scmp.ge.s32.totalorder %s19_s14, 4  }
  0x41   :  { %18 = sbr.rel (!%p16_p6) target bundleno = 16 (0x10), region = 64 }
  0x46   :  { %176 = vsyncpa [#allocation5], 1 }
  0x47   :  { %178 = vsyncpa [#allocation5 + $0x1], 1 }

</bundles_post_ra>
